<compile_context>
chip_gen: v5e
topology: v5e:2x2
jax: 0.10.0
libtpu: 0.0.40
codegen_flags: <defaults>
</compile_context>

<pallas_src>
import math
import functools

import jax
import jax.numpy as jnp
from jax import lax
from jax.experimental import pallas as pl
from jax.experimental.pallas import tpu as pltpu


def _round_up(x, m):
    return (x + m - 1) // m * m


def _vmem_budget_bytes():
    # Generation-aware VMEM cap (v7x: 64 MiB/TC, v5e/v6e: 128 MiB).
    cap = 64 * 1024 * 1024
    try:
        info = pltpu.get_tpu_info()
        cap = int(getattr(info, "vmem_capacity_bytes", cap)) or cap
    except Exception:
        pass
    return int(0.8 * cap)


def _qkv_proj_kernel(e_ref, w_ref, q_ref, k_ref, v_ref, *, d_pad):
    # e_ref: (1, ts, emb) bf16 ; w_ref: (emb, 3*d_pad) bf16 (softmax scale folded
    # into the Q columns, V columns beyond d_k are zero).
    qkv = jnp.dot(e_ref[0], w_ref[...], preferred_element_type=jnp.float32)
    q_ref[0] = qkv[:, :d_pad].astype(q_ref.dtype)                 # pre-scaled Q
    k_ref[0] = qkv[:, d_pad:2 * d_pad].astype(k_ref.dtype)
    v_ref[0] = qkv[:, 2 * d_pad:].astype(v_ref.dtype)


def _flash_att_kernel(*args, need_mask):
    if need_mask:
        q_ref, k_ref, v_ref, bias_ref, o_ref, m_scr, l_scr, acc_scr = args
    else:
        q_ref, k_ref, v_ref, o_ref, m_scr, l_scr, acc_scr = args
        bias_ref = None

    ki = pl.program_id(2)

    @pl.when(ki == 0)
    def _init():
        m_scr[...] = jnp.full(m_scr.shape, -jnp.inf, dtype=m_scr.dtype)
        l_scr[...] = jnp.zeros(l_scr.shape, dtype=l_scr.dtype)
        acc_scr[...] = jnp.zeros(acc_scr.shape, dtype=acc_scr.dtype)

    q = q_ref[0]                                   # (tq, d_pad) bf16, pre-scaled
    k = k_ref[0]                                   # (tk, d_pad) bf16
    # s = q @ k^T: contract the d_pad dim of both operands (no in-kernel transpose).
    s = lax.dot_general(q, k, (((1,), (1,)), ((), ())),
                        preferred_element_type=jnp.float32)        # (tq, tk) f32
    if need_mask:
        # Additive bias: 0 for valid kv positions, -1e30 for padding (f32 only).
        s = s + bias_ref[...]

    m_prev = m_scr[...]
    m_new = jnp.maximum(m_prev, jnp.max(s, axis=-1, keepdims=True))
    alpha = jnp.exp(m_prev - m_new)
    p = jnp.exp(s - m_new)                                          # (tq, tk) f32
    l_scr[...] = alpha * l_scr[...] + jnp.sum(p, axis=-1, keepdims=True)
    acc_scr[...] = alpha * acc_scr[...] + jnp.dot(
        p.astype(v_ref.dtype), v_ref[0], preferred_element_type=jnp.float32)
    m_scr[...] = m_new

    @pl.when(ki == pl.num_programs(2) - 1)
    def _finalize():
        inv_l = pl.reciprocal(l_scr[...], approx=True)              # EUP slot
        o_ref[0] = (acc_scr[...] * inv_l).astype(o_ref.dtype)


def self_att_head_level3(E, WQK, WV, d_k, *, q_tile=256, kv_tile=512):
    """E: (B, S, emb); WQK: (2*d_k, emb); WV: (emb, emb). Returns (B, S, d_k)."""
    B, S, emb = E.shape
    out_dtype = E.dtype
    compute_dtype = jnp.bfloat16            # MXU-native on v5e/v6e/v7x
    scale = 1.0 / math.sqrt(d_k)

    # TODO(synk): the reference Triton kernel is ill-formed (it loads only the
    # first token's K/V with d_k strides over an emb-wide V).  We implement the
    # clearly intended attention using the first d_k columns of the V
    # projection so the output matches torch.empty_like(Q) == (B, S, d_k).

    # ---- lane-dense head dim ------------------------------------------------
    d_pad = _round_up(d_k, 128)

    # ---- sequence tiling: decoupled q / kv tiles ------------------------------
    s_align = 16                                     # bf16 sublane packing
    S_base = _round_up(S, s_align)
    tk = min(kv_tile, S_base)
    S_pad = _round_up(S, tk)
    tq = min(q_tile, tk)
    if S_pad % tq:
        tq = tk
    if B == 1 and S_pad // tq < 2 and tq % 32 == 0:  # v7x: feed both TCs
        tq //= 2
    n_q, n_kv = S_pad // tq, S_pad // tk
    ts = tk                                          # projection seq tile
    need_mask = S_pad != S

    # ---- fused, pre-scaled, lane-padded weight [WQ*scale | WK | WV[:d_k]] ----
    w32 = jnp.zeros((emb, 3 * d_pad), jnp.float32)
    wqk32 = jnp.asarray(WQK, jnp.float32)
    w32 = w32.at[:, :d_k].set(wqk32[:d_k, :].T * scale)
    w32 = w32.at[:, d_pad:d_pad + d_k].set(wqk32[d_k:, :].T)
    w32 = w32.at[:, 2 * d_pad:2 * d_pad + d_k].set(
        jnp.asarray(WV, jnp.float32)[:d_k, :].T)
    w_fused = w32.astype(compute_dtype)

    E_c = E.astype(compute_dtype)
    if need_mask:
        E_c = jnp.pad(E_c, ((0, 0), (0, S_pad - S), (0, 0)))

    budget = _vmem_budget_bytes()

    # ---- 1) fused QKV projection (hoisted out of the kv loop) -----------------
    proj_vmem = (2 * (ts * emb + 3 * ts * d_pad) * 2      # dbl-buffered E + outs (bf16)
                 + 2 * emb * 3 * d_pad * 2                # dbl-buffered weight (bf16)
                 + 4 * ts * 3 * d_pad)                    # f32 matmul result
    qkv_shape = jax.ShapeDtypeStruct((B, S_pad, d_pad), compute_dtype)
    q_all, k_all, v_all = pl.pallas_call(
        functools.partial(_qkv_proj_kernel, d_pad=d_pad),
        out_shape=(qkv_shape, qkv_shape, qkv_shape),
        grid_spec=pltpu.PrefetchScalarGridSpec(
            num_scalar_prefetch=0,
            grid=(B, S_pad // ts),
            in_specs=[
                pl.BlockSpec((1, ts, emb), lambda b, si: (b, si, 0)),
                pl.BlockSpec((emb, 3 * d_pad), lambda b, si: (0, 0)),
            ],
            out_specs=[
                pl.BlockSpec((1, ts, d_pad), lambda b, si: (b, si, 0)),
                pl.BlockSpec((1, ts, d_pad), lambda b, si: (b, si, 0)),
                pl.BlockSpec((1, ts, d_pad), lambda b, si: (b, si, 0)),
            ],
        ),
        compiler_params=pltpu.CompilerParams(
            dimension_semantics=("parallel", "parallel"),
            vmem_limit_bytes=min(budget, max(2 * proj_vmem, 32 * 1024 * 1024)),
        ),
    )(E_c, w_fused)

    # ---- 2) flash attention over precomputed Q/K/V ----------------------------
    in_specs = [
        pl.BlockSpec((1, tq, d_pad), lambda b, qi, ki: (b, qi, 0)),   # Q (scaled)
        pl.BlockSpec((1, tk, d_pad), lambda b, qi, ki: (b, ki, 0)),   # K
        pl.BlockSpec((1, tk, d_pad), lambda b, qi, ki: (b, ki, 0)),   # V
    ]
    inputs = [q_all, k_all, v_all]
    if need_mask:
        bias = jnp.where(jnp.arange(S_pad) < S, 0.0, -1e30).astype(jnp.float32)
        inputs.append(bias.reshape(1, S_pad))
        in_specs.append(pl.BlockSpec((1, tk), lambda b, qi, ki: (0, ki)))

    attn_vmem = (
        2 * (tq * d_pad + 2 * tk * d_pad) * 2 + 2 * tk * 4            # dbl-buffered in
        + 2 * tq * d_pad * jnp.dtype(out_dtype).itemsize              # dbl-buffered out
        + 3 * tq * tk * 4                                             # s / p temporaries
        + (tq * d_pad + 2 * tq) * 4                                   # f32 scratch
    )

    out = pl.pallas_call(
        functools.partial(_flash_att_kernel, need_mask=need_mask),
        out_shape=jax.ShapeDtypeStruct((B, S_pad, d_pad), out_dtype),
        grid_spec=pltpu.PrefetchScalarGridSpec(
            num_scalar_prefetch=0,
            grid=(B, n_q, n_kv),
            in_specs=in_specs,
            out_specs=pl.BlockSpec((1, tq, d_pad), lambda b, qi, ki: (b, qi, 0)),
            scratch_shapes=[
                pltpu.VMEM((tq, 1), jnp.float32),       # running max
                pltpu.VMEM((tq, 1), jnp.float32),       # running denominator
                pltpu.VMEM((tq, d_pad), jnp.float32),   # f32 output accumulator
            ],
        ),
        compiler_params=pltpu.CompilerParams(
            dimension_semantics=("parallel", "parallel", "arbitrary"),
            vmem_limit_bytes=min(budget, max(2 * attn_vmem, 32 * 1024 * 1024)),
        ),
    )(*inputs)

    return out[:, :S, :d_k]


def _reference(E, WQK, WV, d_k):
    qk = E @ WQK.T
    q, k = qk[..., :d_k], qk[..., d_k:]
    v = E @ WV.T
    s = jnp.einsum("bqd,bkd->bqk", q, k) * (1.0 / math.sqrt(d_k))
    a = jax.nn.softmax(s, axis=-1)
    return jnp.einsum("bqk,bkd->bqd", a, v[..., :d_k])


if __name__ == "__main__":
    batch_size = 2
    seq_len = 5
    emb_dim = 8
    d_k = 4

    key = jax.random.PRNGKey(0)
    k_e, k_wqk, k_wv = jax.random.split(key, 3)

    # Deterministic inputs (nn.Linear weight layout: (out_features, in_features)).
    E = jax.random.normal(k_e, (batch_size, seq_len, emb_dim), dtype=jnp.float32)
    WQK = jax.random.normal(k_wqk, (2 * d_k, emb_dim), dtype=jnp.float32) * (
        1.0 / math.sqrt(emb_dim)
    )
    WV = jax.random.normal(k_wv, (emb_dim, emb_dim), dtype=jnp.float32) * (
        1.0 / math.sqrt(emb_dim)
    )

    out = self_att_head_level3(E, WQK, WV, d_k)
    out = jax.block_until_ready(out)

    ref = _reference(E, WQK, WV, d_k)
    assert out.shape == (batch_size, seq_len, d_k), out.shape
    # Tolerance accounts for the deliberate bf16 MXU path + approx reciprocal.
    assert jnp.allclose(out, ref, atol=5e-2, rtol=5e-2), (
        float(jnp.max(jnp.abs(out - ref)))
    )

    print("KERNEL_OK")
</pallas_src>

<mosaic_0001>
module attributes {stable_mosaic.version = 11 : i64} {
  func.func @_qkv_proj_kernel(%arg0: i32, %arg1: i32, %arg2: memref<1x16x8xbf16, #tpu.memory_space<vmem>>, %arg3: memref<8x384xbf16, #tpu.memory_space<vmem>>, %arg4: memref<1x16x128xbf16, #tpu.memory_space<vmem>>, %arg5: memref<1x16x128xbf16, #tpu.memory_space<vmem>>, %arg6: memref<1x16x128xbf16, #tpu.memory_space<vmem>>) attributes {dimension_semantics = [#tpu.dimension_semantics<parallel>, #tpu.dimension_semantics<parallel>], iteration_bounds = array<i64: 2, 1>, scalar_prefetch = 0 : i64, scratch_operands = 0 : i64, tpu.core_type = #tpu.core_type<tc>, window_params = [{transform_indices = @transform_0, window_bounds = array<i64: 1, 16, 8>}, {pipeline_mode = #tpu.pipeline_mode<synchronous>, transform_indices = @transform_1, window_bounds = array<i64: 8, 384>}, {transform_indices = @transform_2, window_bounds = array<i64: 1, 16, 128>}, {transform_indices = @transform_3, window_bounds = array<i64: 1, 16, 128>}, {transform_indices = @transform_4, window_bounds = array<i64: 1, 16, 128>}]} {
    %c0 = arith.constant 0 : index
    %c0_0 = arith.constant 0 : index
    %c0_1 = arith.constant 0 : index
    %0 = vector.load %arg2[%c0, %c0_0, %c0_1] : memref<1x16x8xbf16, #tpu.memory_space<vmem>>, vector<1x16x8xbf16>
    %1 = vector.shape_cast %0 : vector<1x16x8xbf16> to vector<16x8xbf16>
    %c0_2 = arith.constant 0 : index
    %c0_3 = arith.constant 0 : index
    %2 = vector.load %arg3[%c0_2, %c0_3] : memref<8x384xbf16, #tpu.memory_space<vmem>>, vector<8x384xbf16>
    %cst = arith.constant dense<0.000000e+00> : vector<16x384xf32>
    %3 = tpu.matmul %1, %2, %cst {dimension_numbers = #tpu.dot_dimension_numbers<[1], [0], [0], [1], [0, 0, 1, 1], [], []>} : vector<16x8xbf16>, vector<8x384xbf16>, vector<16x384xf32> -> vector<16x384xf32>
    %4 = vector.extract_strided_slice %3 {offsets = [0, 0], sizes = [16, 128], strides = [1, 1]} : vector<16x384xf32> to vector<16x128xf32>
    %5 = arith.truncf %4 : vector<16x128xf32> to vector<16x128xbf16>
    %c0_4 = arith.constant 0 : index
    %c0_5 = arith.constant 0 : index
    %c0_6 = arith.constant 0 : index
    %6 = vector.load %arg4[%c0_4, %c0_5, %c0_6] : memref<1x16x128xbf16, #tpu.memory_space<vmem>>, vector<1x16x128xbf16>
    %7 = vector.shape_cast %6 : vector<1x16x128xbf16> to vector<16x128xbf16>
    %8 = vector.shape_cast %5 : vector<16x128xbf16> to vector<1x16x128xbf16>
    tpu.vector_store %arg4[%c0_4, %c0_5, %c0_6], %8 {strides = array<i32>} : memref<1x16x128xbf16, #tpu.memory_space<vmem>>, vector<1x16x128xbf16>,
    %9 = vector.extract_strided_slice %3 {offsets = [0, 128], sizes = [16, 128], strides = [1, 1]} : vector<16x384xf32> to vector<16x128xf32>
    %10 = arith.truncf %9 : vector<16x128xf32> to vector<16x128xbf16>
    %c0_7 = arith.constant 0 : index
    %c0_8 = arith.constant 0 : index
    %c0_9 = arith.constant 0 : index
    %11 = vector.load %arg5[%c0_7, %c0_8, %c0_9] : memref<1x16x128xbf16, #tpu.memory_space<vmem>>, vector<1x16x128xbf16>
    %12 = vector.shape_cast %11 : vector<1x16x128xbf16> to vector<16x128xbf16>
    %13 = vector.shape_cast %10 : vector<16x128xbf16> to vector<1x16x128xbf16>
    tpu.vector_store %arg5[%c0_7, %c0_8, %c0_9], %13 {strides = array<i32>} : memref<1x16x128xbf16, #tpu.memory_space<vmem>>, vector<1x16x128xbf16>,
    %14 = vector.extract_strided_slice %3 {offsets = [0, 256], sizes = [16, 128], strides = [1, 1]} : vector<16x384xf32> to vector<16x128xf32>
    %15 = arith.truncf %14 : vector<16x128xf32> to vector<16x128xbf16>
    %c0_10 = arith.constant 0 : index
    %c0_11 = arith.constant 0 : index
    %c0_12 = arith.constant 0 : index
    %16 = vector.load %arg6[%c0_10, %c0_11, %c0_12] : memref<1x16x128xbf16, #tpu.memory_space<vmem>>, vector<1x16x128xbf16>
    %17 = vector.shape_cast %16 : vector<1x16x128xbf16> to vector<16x128xbf16>
    %18 = vector.shape_cast %15 : vector<16x128xbf16> to vector<1x16x128xbf16>
    tpu.vector_store %arg6[%c0_10, %c0_11, %c0_12], %18 {strides = array<i32>} : memref<1x16x128xbf16, #tpu.memory_space<vmem>>, vector<1x16x128xbf16>,
    return
  }
  func.func @transform_0(%arg0: i32, %arg1: i32) -> (i32, i32, i32) {
    %c0_i32 = arith.constant 0 : i32
    %c0_i32_0 = arith.constant 0 : i32
    return %arg0, %arg1, %c0_i32 : i32, i32, i32
  }
  func.func @transform_1(%arg0: i32, %arg1: i32) -> (i32, i32) {
    %c0_i32 = arith.constant 0 : i32
    %c0_i32_0 = arith.constant 0 : i32
    %c0_i32_1 = arith.constant 0 : i32
    return %c0_i32, %c0_i32_0 : i32, i32
  }
  func.func @transform_2(%arg0: i32, %arg1: i32) -> (i32, i32, i32) {
    %c0_i32 = arith.constant 0 : i32
    %c0_i32_0 = arith.constant 0 : i32
    return %arg0, %arg1, %c0_i32 : i32, i32, i32
  }
  func.func @transform_3(%arg0: i32, %arg1: i32) -> (i32, i32, i32) {
    %c0_i32 = arith.constant 0 : i32
    %c0_i32_0 = arith.constant 0 : i32
    return %arg0, %arg1, %c0_i32 : i32, i32, i32
  }
  func.func @transform_4(%arg0: i32, %arg1: i32) -> (i32, i32, i32) {
    %c0_i32 = arith.constant 0 : i32
    %c0_i32_0 = arith.constant 0 : i32
    return %arg0, %arg1, %c0_i32 : i32, i32, i32
  }
}

</mosaic_0001>

<bundles_post_ra>
// kernel: tpu_custom_call.1
= control target key start
LH: loop header
LB: loop body
LE: loop exit
PB: predicated region body
PF: predicated region fallthrough
CT: control target
= control target key end

     0   :  { %s1025_s0 = inlined_call_operand.vmem [shape: bf16[2,16,8], index: 0, kind: input, shape index: {}]   ;;  %s1026_s1 = inlined_call_operand.vmem [shape: bf16[8,384], index: 1, kind: input, shape index: {}]   ;;  %s1027_s2 = inlined_call_operand.hbm [shape: bf16[2,16,128], index: 2, kind: output, shape index: {0}]   ;;  %s1028_s3 = inlined_call_operand.hbm [shape: bf16[2,16,128], index: 3, kind: output, shape index: {1}]   ;;  %s1029_s4 = inlined_call_operand.hbm [shape: bf16[2,16,128], index: 4, kind: output, shape index: {2}]  }
   0x1   :  { %1035 = sst [smem:[#allocation11_spill]] %s1025_s0 }
   0x2   :  { %1036 = sst [smem:[#allocation12_spill]] %s1026_s1 }
   0x3   :  { %1037 = sst [smem:[#allocation13_spill]] %s1028_s3 }
   0x4   :  { %10 = vsyncpa [#allocation3], 0 }
   0x5   :  { %12 = vsyncpa [#allocation3 + $0x1], 0 }
   0x6   :  { %13 = vsyncpa [#allocation5], 0 }
   0x7   :  { %15 = vsyncpa [#allocation5 + $0x1], 0  ;;  %s833_s15 = smov 0   ;;  %s835_s16 = smov 0  }
   0x8   :  { %s837_s17 = smov 0   ;;  %s839_s18 = smov 0  }
   0x9   :  { %s841_s19 = smov 0   ;;  %s843_s20 = smov 0  }
   0xa LB: > { %s551_s21 = sadd.s32 4294967295, %s804_s20   ;;  %s1030_s22 = sadd.s32 4294967294, %s804_s20   ;;  %s804_s20 = sphi %s843_s20, %s21_s20   ;;  %s800_s19 = sphi %s841_s19, %s1056_s19   ;;  %s796_s18 = sphi %s839_s18, %s1055_s18   ;;  %s792_s17 = sphi %s837_s17, %s1054_s17   ;;  %s788_s16 = sphi %s835_s16, %s1053_s16   ;;  %s784_s15 = sphi %s833_s15, %s1052_s15  }
   0xb   : > { %s33_s23 = sadd.s32 1, %s800_s19  ;;  %s91_s24 = sadd.s32 1, %s792_s17 }
   0xc   : > { %p35_p0 = scmp.ge.s32.totalorder %s33_s23, 2  ;;  %p101_p1 = scmp.ne.s32.totalorder %s792_s17, %s788_s16 }
   0xd   : > { %p102_p2 = scmp.eq.s32.totalorder %s551_s21, 1  ;;  %p107_p3 = scmp.ne.s32.totalorder %s788_s16, %s784_s15 }
   0xe   : > { %s1058_s23 = smov (%p35_p0, %s33_s23), 0  ;;  %p108_p5 = scmp.eq.s32.totalorder %s1030_s22, 1 }
   0xf   : > { %p875_p4 = por %p102_p2, %p101_p1  ;;  %s86_s26 = ssub.s32 %s800_s19, %s1058_s23 }
  0x10   : > { %p555_p6 = scmp.ge.s32.totalorder %s804_s20, 1  ;;  %p89_p7 = scmp.eq.s32.totalorder %s86_s26, 0 }
  0x11   : > { %p884_p8 = por %p108_p5, %p107_p3  ;;  %p198_p9 = scmp.lt.s32.totalorder %s804_s20, 3 }
  0x12   : > { %s890_s28 = scalar_select %p89_p7, %s792_s17, %s91_s24  }
  0x13   : > { %p199_p10 = pnand %p555_p6, %p198_p9 }
  0x15   : > { %202 = sbr.rel (%p199_p10) target bundleno = 212 (0xd4), region = 28 }
  0x1a   : > { %s1040_s1 = sld [smem:[#allocation12_spill]]  ;;  %p239_p11 = scmp.lt.s32.totalorder %s796_s18, 1  ;;  %vm273_vm0 = vcmask 1043456   ;;  %vm269_vm1 = vcmask 64512  }
  0x1b   : > { %s1041_s0 = sld [smem:[#allocation11_spill]]  ;;  %s1031_s12 = sand.u32 1, %s788_s16  }
  0x1c   : > { %s240_s7 = scalar_select %p239_p11, %s796_s18, 1 }
  0x1d   : > { %s906_s13 = sshll.u32 %s1031_s12, 3  ;;  %s581_s14 = sshll.u32 %s796_s18, 3 }
  0x1e   : > { %s579_s8 = sshll.u32 %s240_s7, 3  ;;  %s230_s24 = scalar_lea.vmem [#allocation4], %s906_s13 }
  0x1f   : > { %s910_s26 = sshll.u32 %s230_s24, 4  ;;  %s1043_s3 = sld [smem:[#allocation13_spill]] }
  0x20   : > { %v254_v0 = vld [vmem:[%s1040_s1] sm:$0xff]  ;;  %v255_v1 = vld [vmem:[%s1040_s1 + $0x8] sm:$0xf]  ;;  %1042 = sst [smem:[#allocation9_spill]] %s910_s26  ;;  %s917_s6 = sand.u32 1, %s551_s21  }
  0x21   : > { %v263_v2 = vunpack.c.l.b16 %v254_v0  ;;  %v264_v3 = vunpack.c.h.b16 %v254_v0  ;;  %v265_v4 = vunpack.c.l.b16 %v255_v1  ;;  %s246_s11 = scalar_lea.vmem %s1041_s0, %s579_s8  ;;  %s361_s9 = scalar_lea.hbm %s1027_s2, %s581_s14 }
  0x22   : > { %v580_v11 = vld [vmem:[%s246_s11] sm:$0xff]  ;;  %s223_s10 = scalar_lea.vmem [#allocation2], %s906_s13  ;;  %s928_s21 = sshll.u32 %s361_s9, 4  ;;  %s365_s21 = int_to_ptr.hbm [resolvable:$true] %s928_s21 }
  0x23   : > { %v266_v5 = vpack.c.b16 %v263_v2, %v263_v2  ;;  %v267_v6 = vpack.c.b16 %v264_v3, %v264_v3  ;;  %v268_v7 = vpack.c.b16 %v265_v4, %v265_v4  ;;  %s923_s11 = sshll.u32 %s223_s10, 4  ;;  %s399_s7 = scalar_lea.hbm %s1029_s4, %s581_s14 }
  0x24   : > { %1044 = sst [smem:[#allocation10_spill]] %s923_s11  ;;  %s941_s22 = sshll.u32 %s399_s7, 4  ;;  %s403_s22 = int_to_ptr.hbm [resolvable:$true] %s941_s22 }
  0x25   : > { %v275_v8 = vsel %vm273_vm0, %v266_v5, 0  ;;  %v278_v9 = vsel %vm273_vm0, %v267_v6, 0  ;;  %v281_v10 = vsel %vm273_vm0, %v268_v7, 0  ;;  %s380_s5 = scalar_lea.hbm %s1043_s3, %s581_s14  ;;  %s343_s9 = scalar_lea.sflag [#allocation5], %s917_s6 }
  0x26   : > { %290 = vmatpush.bf16.msra.mxu0 %v275_v8  ;;  %304 = vmatpush.bf16.msra.mxu1 %v278_v9  ;;  %s926_s18 = sshll.u32 %s380_s5, 4  ;;  %s1033_s5 = scalar_lea.vmem [#allocation6], %s906_s13  ;;  %s384_s18 = int_to_ptr.hbm [resolvable:$true] %s926_s18 }
  0x27   : > { %318 = vmatpush.bf16.msra.mxu2 %v281_v10  ;;  %s939_s8 = sshll.u32 %s1033_s5, 4  ;;  %s680_s12 = sshra.s32 %s384_s18, 4  ;;  %s681_s12 = int_to_ptr.hbm [resolvable:$true] %s680_s12  ;;  %s401_s8 = int_to_ptr.vmem [resolvable:$true] %s939_s8 }
  0x28   : > { %s682_s26 = scalar_lea.hbm %s681_s12, 8  ;;  %p687_p1 = scmp.lt.s32.totalorder %s681_s12, %s1043_s3 }
  0x29   : > { %565 = vmatmul.msk.bf16.vlgmr.msra.gmra.mxu0 %vm269_vm1, %v580_v11  ;;  %566 = vmatmul.msk.bf16.vlgmr.msra.gmra.mxu1 %vm269_vm1, %v580_v11  ;;  %p683_p12 = scmp.ne.s32.totalorder %s681_s12, %s682_s26 }
  0x2a   : > { %567 = vmatmul.msk.bf16.vlgmr.msra.gmra.mxu2 %vm269_vm1, %v580_v11 }
  0x2b   : > { %p684_p13 = pnand %p683_p12, %p875_p4 }
  0x2d   : > { %p685_p0 = pneg %p684_p13 }
  0xa6   : > { %v292_v12 = vpop.f32.mrf.mxu0  ;;  %v306_v13 = vpop.f32.mrf.mxu1 }
  0xad   : > { %v320_v14 = vpop.f32.mrf.mxu2 }
  0xae   : > { %v294_v15 = vpop.f32.mrf.mxu0  ;;  %v308_v16 = vpop.f32.mrf.mxu1 }
  0xaf   : > { %v587_v17 = vpack.c.bf16 %v294_v15, %v292_v12  ;;  %v592_v18 = vpack.c.bf16 %v308_v16, %v306_v13 }
  0xb1   : > { %588 = vst [vmem:[%s223_s10] sm:$0xff] %v587_v17   ;;  %s686_s10 = scalar_lea.hbm %s1043_s3, 16 }
  0xb2   : > { %593 = vst [vmem:[%s230_s24] sm:$0xff] %v592_v18   ;;  %p688_p2 = scmp.lt.s32.totalorder %s686_s10, %s682_s26 }
  0xb4   : > { %p689_p3 = por %p688_p2, %p687_p1 }
  0xb6   : > { %p690_p5 = pnand %p689_p3, %p685_p0 }
  0xb8   : > { %693 = shalt.err (!%p690_p5)
}
  0xb9   : > { %s806_s7 = smov 64   ;;  %s1045_s5 = sld [smem:[#allocation9_spill]] }
  0xba   : > { %s807_s11 = smov 4   ;;  %s1047_s12 = sand.u32 1, %s788_s16  }
  0xbb   : > { %s338_s26 = scalar_lea.sflag [#allocation3], %s1047_s12  ;;  %s708_s29 = sshra.s32 %s365_s21, 4  ;;  %s709_s29 = int_to_ptr.hbm [resolvable:$true] %s708_s29 }
  0xbc   : > { %s710_s10 = scalar_lea.hbm %s709_s29, 8  ;;  %s714_s0 = scalar_lea.hbm %s1027_s2, 16 }
  0xbd   : > { %p711_p6 = scmp.ne.s32.totalorder %s709_s29, %s710_s10  ;;  %p715_p10 = scmp.lt.s32.totalorder %s709_s29, %s1027_s2 }
  0xbe   : > { %p716_p11 = scmp.lt.s32.totalorder %s714_s0, %s710_s10 }
  0xbf   : > { %s1046_s14 = int_to_ptr.vmem [resolvable:$true] %s1045_s5  ;;  %p712_p7 = pnand %p711_p6, %p875_p4 }
  0xc0   : > { %600 = dma.vmem_to_hbm [thread:$0]  (%p875_p4), %s1046_s14, 128, %s384_s18, %s343_s9, %s806_s7, %s806_s7, %s807_s11  }
  0xc1   : > { %p713_p9 = pneg %p712_p7  ;;  %p717_p12 = por %p716_p11, %p715_p10 }
  0xc3   : > { %p718_p13 = pnand %p717_p12, %p713_p9 }
  0xc5   : > { %721 = shalt.err (!%p718_p13)
}
  0xc6   : > { %s1048_s18 = sld [smem:[#allocation10_spill]]  ;;  %v322_v19 = vpop.f32.mrf.mxu2  ;;  %s1050_s0 = scalar_lea.vmem [#allocation6], %s906_s13 }
  0xc7   : > { %v597_v20 = vpack.c.bf16 %v322_v19, %v320_v14  ;;  %s736_s1 = sshra.s32 %s403_s22, 4  ;;  %s742_s29 = scalar_lea.hbm %s1029_s4, 16  ;;  %s737_s1 = int_to_ptr.hbm [resolvable:$true] %s736_s1 }
  0xc8   : > { %s738_s3 = scalar_lea.hbm %s737_s1, 8  ;;  %p743_p3 = scmp.lt.s32.totalorder %s737_s1, %s1029_s4 }
  0xc9   : > { %598 = vst [vmem:[%s1050_s0] sm:$0xff] %v597_v20   ;;  %p739_p0 = scmp.ne.s32.totalorder %s737_s1, %s738_s3  ;;  %p744_p5 = scmp.lt.s32.totalorder %s742_s29, %s738_s3 }
  0xcb   : > { %p740_p1 = pnand %p739_p0, %p875_p4  ;;  %p745_p6 = por %p744_p5, %p743_p3 }
  0xcc   : > { %s1049_s5 = int_to_ptr.vmem [resolvable:$true] %s1048_s18 }
  0xcd   : > { %599 = dma.vmem_to_hbm [thread:$0]  (%p875_p4), %s1049_s5, 128, %s365_s21, %s338_s26, %s806_s7, %s806_s7, %s807_s11  }
  0xce   : > { %p741_p2 = pneg %p740_p1 }
  0xd0   : > { %p746_p7 = pnand %p745_p6, %p741_p2 }
  0xd2   : > { %749 = shalt.err (!%p746_p7)
}
  0xd3   : > { %601 = dma.vmem_to_hbm [thread:$0]  (%p875_p4), %s401_s8, 128, %s403_s22, %s343_s9, %s806_s7, %s806_s7, %s807_s11  }
  0xd4 PF: > { %p615_p9 = scmp.ge.s32.totalorder %s804_s20, 2  ;;  %s417_s13 = sand.u32 1, %s784_s15  }
  0xd5   : > { %s418_s21 = scalar_lea.sflag [#allocation3], %s417_s13 }
  0xd6   : > { %p606_p10 = pnand %p615_p9, %p884_p8 }
  0xd8   : > { %p607_p11 = pneg %p606_p10 }
  0xda   : > { %775 = dma.done.wait (%p607_p11), %s418_s21, 128  }
  0xdb   : > { %777 = vsyncadd (%p607_p11), %s418_s21, 4294967168  ;;  %s1051_s25 = sadd.s32 4294967294, %s804_s20  }
  0xdc   : > { %s427_s26 = sand.u32 1, %s1051_s25  }
  0xdd   : > { %s428_s24 = scalar_lea.sflag [#allocation5], %s427_s26 }
  0xde   : > { %779 = dma.done.wait (%p607_p11), %s428_s24, 256  }
  0xdf   : > { %781 = vsyncadd (%p607_p11), %s428_s24, 4294967040  ;;  %s21_s20 = sadd.s32 1, %s804_s20   ;;  %s1052_s15 = smov %s788_s16 }
  0xe0   : > { %p18_p4 = scmp.ge.s32.totalorder %s21_s20, 4   ;;  %s1053_s16 = smov %s792_s17 }
  0xe1   : > { %s1054_s17 = smov %s890_s28  ;;  %s1055_s18 = smov %s800_s19 }
  0xe2   : > { %s1056_s19 = smov %s1058_s23  ;;  %20 = sbr.rel (!%p18_p4) target bundleno = 10 (0xa), region = 95 }
  0xe7   :  { %444 = vsyncpa [#allocation3], 1 }
  0xe8   :  { %446 = vsyncpa [#allocation3 + $0x1], 1 }
  0xe9   :  { %447 = vsyncpa [#allocation5], 1 }
  0xea   :  { %449 = vsyncpa [#allocation5 + $0x1], 1 }

</bundles_post_ra>
